<compile_context>
chip_gen: v7x
topology: tpu7x:2x2x1
jax: 0.10.0
libtpu: 0.0.40
codegen_flags: <defaults>
</compile_context>

<pallas_src>
import functools

import jax
import jax.numpy as jnp
from jax.experimental import pallas as pl
from jax.experimental.pallas import tpu as pltpu

_EPS = 1e-5
_LANE = 128


def _round_up(n, m=_LANE):
    return ((n + m - 1) // m) * m


def _decoder_kernel(num_layers, n_valid, tile_b, b_pad, out_widths, *refs):
    """refs = (x, [w, gamma, beta] * L, out, y_buf, sum, sumsq, scale, shift)."""
    x_ref = refs[0]
    params = refs[1:1 + 3 * num_layers]
    o_ref = refs[1 + 3 * num_layers]
    y_buf, sum_ref, sq_ref, scale_ref, shift_ref = refs[2 + 3 * num_layers:]

    p = pl.program_id(0)                   # layer phase: 0 .. num_layers
    t = pl.program_id(1)                   # batch tile index
    inv_n = 1.0 / n_valid
    row0 = pl.multiple_of(t * tile_b, 8)   # sublane-aligned tile start in y_buf

    needs_mask = (b_pad != n_valid)        # python-static
    if needs_mask:
        rows = jax.lax.broadcasted_iota(jnp.int32, (tile_b, 1), 0) + t * tile_b
        row_mask = (rows < n_valid).astype(jnp.float32)

    def linear_and_stats(h, layer):
        """y = h @ W_layer (bf16 in, f32 acc); stash y; accumulate batch stats."""
        w_ref = params[3 * layer]
        dw = out_widths[layer]
        y = jnp.dot(h.astype(w_ref.dtype), w_ref[...],
                    preferred_element_type=jnp.float32)
        y_buf[pl.ds(row0, tile_b), :dw] = y
        sum_ref[:, :dw] += jnp.sum(y, axis=0, keepdims=True)
        sq_ref[:, :dw] += jnp.sum(y * y, axis=0, keepdims=True)

    # ---- Phase 0: layer-0 linear from the streamed-in x tile ----------------
    @pl.when(p == 0)
    def _():
        @pl.when(t == 0)
        def _():
            sum_ref[...] = jnp.zeros_like(sum_ref)
            sq_ref[...] = jnp.zeros_like(sq_ref)
        linear_and_stats(x_ref[...], 0)

    # ---- Phases 1..L: BN+ReLU of layer (phase-1); then next linear or output -
    for layer in range(num_layers):
        phase = layer + 1

        @pl.when(p == phase)
        def _(layer=layer, phase=phase):
            g_ref = params[3 * layer + 1]
            be_ref = params[3 * layer + 2]
            dw = out_widths[layer]

            @pl.when(t == 0)
            def _():
                # Finalize layer `layer` full-batch stats (accumulated during the
                # previous phase), fold into one scale/shift, reset accumulators.
                mean = sum_ref[:, :dw] * inv_n
                var = jnp.maximum(sq_ref[:, :dw] * inv_n - mean * mean, 0.0)
                scale = g_ref[...] * jax.lax.rsqrt(var + _EPS)
                scale_ref[:, :dw] = scale
                shift_ref[:, :dw] = be_ref[...] - mean * scale
                sum_ref[...] = jnp.zeros_like(sum_ref)
                sq_ref[...] = jnp.zeros_like(sq_ref)

            y_prev = y_buf[pl.ds(row0, tile_b), :dw]
            # Folded BN + ReLU: one FMA + one max per element.
            h = jnp.maximum(y_prev * scale_ref[:, :dw] + shift_ref[:, :dw], 0.0)

            if phase < num_layers:
                if needs_mask:
                    h = h * row_mask     # keep padded batch rows out of stats
                linear_and_stats(h, phase)
            else:
                o_ref[...] = h           # streamed-out output tile


class DecoderPallas:
    """Mirrors the PyTorch Decoder: reversed embedding dims + input_dim."""

    def __init__(self, input_dim, embedding_dim, key, matmul_dtype=jnp.bfloat16):
        decoder_dim = [d for d in reversed(embedding_dim)]
        decoder_dim.append(input_dim)
        self.dims = decoder_dim
        self.out_dim = input_dim
        self.num_layers = len(decoder_dim) - 1
        self.matmul_dtype = matmul_dtype

        self._d0_pad = _round_up(decoder_dim[0])
        self._out_widths = [_round_up(d) for d in decoder_dim[1:]]
        self._out_dim_p = self._out_widths[-1]
        self._wmax = max(self._out_widths)

        self.params = []          # unpadded f32 (incl. bias) for the references
        self.padded_params = []   # lane-padded (w bf16, gamma/beta f32), no bias
        for i in range(self.num_layers):
            d_in, d_out = decoder_dim[i], decoder_dim[i + 1]
            key, kw, kb = jax.random.split(key, 3)
            # Deterministic init mimicking nn.Linear's uniform(-1/sqrt(in), 1/sqrt(in))
            bound = 1.0 / (d_in ** 0.5)
            w = jax.random.uniform(kw, (d_in, d_out), jnp.float32, -bound, bound)
            b = jax.random.uniform(kb, (d_out,), jnp.float32, -bound, bound)
            gamma = jnp.ones((d_out,), jnp.float32)   # BatchNorm1d default affine
            beta = jnp.zeros((d_out,), jnp.float32)
            self.params.append((w, b, gamma, beta))

            d_in_p = self._d0_pad if i == 0 else self._out_widths[i - 1]
            d_out_p = self._out_widths[i]
            w_p = jnp.zeros((d_in_p, d_out_p), jnp.float32).at[:d_in, :d_out].set(w)
            w_p = w_p.astype(matmul_dtype)
            g_p = jnp.ones((1, d_out_p), jnp.float32).at[:, :d_out].set(gamma)
            be_p = jnp.zeros((1, d_out_p), jnp.float32).at[:, :d_out].set(beta)
            # NOTE: bias deliberately NOT passed to the kernel — it cancels under
            # training-mode BatchNorm (y - mean(y) is invariant to +b).
            self.padded_params.append((w_p, g_p, be_p))

    def __call__(self, x, *, max_tile_rows=1024):
        n = x.shape[0]
        d0 = self.dims[0]
        L = self.num_layers

        n8 = _round_up(n, 8)
        tile_cap = max(8, (max_tile_rows // 8) * 8)
        tile_b = min(n8, tile_cap)
        b_pad = _round_up(n, tile_b)
        num_tiles = b_pad // tile_b

        # Lane-dense, zero-padded input (pad rows are zero -> no stats pollution
        # in layer 0; deeper layers mask pad rows explicitly).
        x_p = jnp.zeros((b_pad, self._d0_pad), jnp.float32).at[:n, :d0].set(x)
        flat = [r for layer in self.padded_params for r in layer]

        def x_map(p, t):
            # Only phase 0 consumes x; keep block index pinned afterwards so the
            # pipeline does not re-DMA x tiles during later phases.
            return (jnp.where(p == 0, t, 0), 0)

        def out_map(p, t):
            # Only the final phase writes output tiles.
            return (jnp.where(p == L, t, 0), 0)

        in_specs = [pl.BlockSpec((tile_b, self._d0_pad), x_map)]
        for arr in flat:
            # Loop-invariant parameter blocks: fetched once, resident for the grid.
            in_specs.append(pl.BlockSpec(arr.shape, lambda p, t: (0, 0)))
        out_spec = pl.BlockSpec((tile_b, self._out_dim_p), out_map)

        scratch = [
            pltpu.VMEM((b_pad, self._wmax), jnp.float32),   # whole-batch pre-BN activations
            pltpu.VMEM((1, self._wmax), jnp.float32),        # running sum
            pltpu.VMEM((1, self._wmax), jnp.float32),        # running sum of squares
            pltpu.VMEM((1, self._wmax), jnp.float32),        # folded BN scale
            pltpu.VMEM((1, self._wmax), jnp.float32),        # folded BN shift
        ]

        param_bytes = sum(int(a.size) * a.dtype.itemsize for a in flat)
        vmem_needed = (b_pad * self._wmax * 4
                       + 2 * tile_b * (self._d0_pad + self._out_dim_p) * 4
                       + param_bytes + 6 * self._wmax * 4 + (1 << 20))
        ckw = dict(dimension_semantics=("arbitrary", "arbitrary"))
        if vmem_needed > (24 << 20):
            # TODO(synk): beyond VMEM capacity (64 MiB on v7x) the whole-batch
            # activation scratch should spill to HBM / go two-level; not needed here.
            ckw["vmem_limit_bytes"] = int(min(vmem_needed + (4 << 20), 64 << 20))

        out_p = pl.pallas_call(
            functools.partial(_decoder_kernel, L, n, tile_b, b_pad,
                              tuple(self._out_widths)),
            out_shape=jax.ShapeDtypeStruct((b_pad, self._out_dim_p), jnp.float32),
            grid_spec=pltpu.PrefetchScalarGridSpec(
                num_scalar_prefetch=0,
                grid=(L + 1, num_tiles),
                in_specs=in_specs,
                out_specs=out_spec,
                scratch_shapes=scratch),
            compiler_params=pltpu.CompilerParams(**ckw),
        )(x_p, *flat)
        return out_p[:n, :self.out_dim]


def _reference_f32(x, params):
    """PyTorch-faithful reference: f32 matmul + bias, two-pass training-mode BN."""
    for (w, b, gamma, beta) in params:
        y = x @ w + b
        mean = jnp.mean(y, axis=0, keepdims=True)
        var = jnp.mean((y - mean) ** 2, axis=0, keepdims=True)
        x = jnp.maximum((y - mean) / jnp.sqrt(var + _EPS) * gamma + beta, 0.0)
    return x


def _reference_matched(x, params, matmul_dtype):
    """Reference mirroring the kernel's arithmetic (bf16 matmul inputs, no bias,
    one-pass variance, folded scale/shift) for a tight numerical check."""
    h = x
    for (w, b, gamma, beta) in params:
        y = jnp.dot(h.astype(matmul_dtype), w.astype(matmul_dtype),
                    preferred_element_type=jnp.float32)
        mean = jnp.mean(y, axis=0, keepdims=True)
        var = jnp.maximum(jnp.mean(y * y, axis=0, keepdims=True) - mean * mean, 0.0)
        scale = gamma * jax.lax.rsqrt(var + _EPS)
        shift = beta - mean * scale
        h = jnp.maximum(y * scale + shift, 0.0)
    return h


if __name__ == "__main__":
    key = jax.random.PRNGKey(0)
    k_init, k_x, k_x2 = jax.random.split(key, 3)

    input_dim = 16                 # dimension of the reconstructed output
    embedding_dim = [64, 32, 8]    # encoder hidden dims; latent dim = 8
    batch = 8

    dec = DecoderPallas(input_dim, embedding_dim, k_init)
    latent_dim = embedding_dim[-1]

    # Main run: small batch, single tile.
    x = jax.random.normal(k_x, (batch, latent_dim), jnp.float32)
    out = jax.block_until_ready(dec(x))
    assert out.shape == (batch, input_dim), out.shape

    ref_m = _reference_matched(x, dec.params, dec.matmul_dtype)
    assert jnp.allclose(out, ref_m, atol=5e-3, rtol=5e-3), \
        float(jnp.max(jnp.abs(out - ref_m)))
    # Loose semantic check vs PyTorch-faithful f32 math (slack covers bf16 MXU inputs).
    ref_f = _reference_f32(x, dec.params)
    assert jnp.allclose(out, ref_f, atol=1.5e-1, rtol=1.5e-1), \
        float(jnp.max(jnp.abs(out - ref_f)))

    # Multi-tile + ragged-batch run: exercises cross-tile BN stat accumulation
    # and padded-row masking (200 rows, tile of 64 -> 4 tiles, 56 masked rows).
    x2 = jax.random.normal(k_x2, (200, latent_dim), jnp.float32)
    out2 = jax.block_until_ready(dec(x2, max_tile_rows=64))
    assert out2.shape == (200, input_dim), out2.shape
    ref2 = _reference_matched(x2, dec.params, dec.matmul_dtype)
    assert jnp.allclose(out2, ref2, atol=5e-3, rtol=5e-3), \
        float(jnp.max(jnp.abs(out2 - ref2)))

    print("KERNEL_OK")
</pallas_src>

<mosaic_0001>
module attributes {stable_mosaic.version = 11 : i64} {
  func.func @_decoder_kernel(%arg0: i32, %arg1: i32, %arg2: memref<8x128xf32, #tpu.memory_space<vmem>>, %arg3: memref<128x128xbf16, #tpu.memory_space<vmem>>, %arg4: memref<1x128xf32, #tpu.memory_space<vmem>>, %arg5: memref<1x128xf32, #tpu.memory_space<vmem>>, %arg6: memref<128x128xbf16, #tpu.memory_space<vmem>>, %arg7: memref<1x128xf32, #tpu.memory_space<vmem>>, %arg8: memref<1x128xf32, #tpu.memory_space<vmem>>, %arg9: memref<128x128xbf16, #tpu.memory_space<vmem>>, %arg10: memref<1x128xf32, #tpu.memory_space<vmem>>, %arg11: memref<1x128xf32, #tpu.memory_space<vmem>>, %arg12: memref<8x128xf32, #tpu.memory_space<vmem>>, %arg13: memref<8x128xf32, #tpu.memory_space<vmem>>, %arg14: memref<1x128xf32, #tpu.memory_space<vmem>>, %arg15: memref<1x128xf32, #tpu.memory_space<vmem>>, %arg16: memref<1x128xf32, #tpu.memory_space<vmem>>, %arg17: memref<1x128xf32, #tpu.memory_space<vmem>>) attributes {dimension_semantics = [#tpu.dimension_semantics<arbitrary>, #tpu.dimension_semantics<arbitrary>], iteration_bounds = array<i64: 4, 1>, scalar_prefetch = 0 : i64, scratch_operands = 5 : i64, tpu.core_type = #tpu.core_type<tc>, window_params = [{transform_indices = @transform_0, window_bounds = array<i64: 8, 128>}, {pipeline_mode = #tpu.pipeline_mode<synchronous>, transform_indices = @transform_1, window_bounds = array<i64: 128, 128>}, {pipeline_mode = #tpu.pipeline_mode<synchronous>, transform_indices = @transform_2, window_bounds = array<i64: 1, 128>}, {pipeline_mode = #tpu.pipeline_mode<synchronous>, transform_indices = @transform_3, window_bounds = array<i64: 1, 128>}, {pipeline_mode = #tpu.pipeline_mode<synchronous>, transform_indices = @transform_4, window_bounds = array<i64: 128, 128>}, {pipeline_mode = #tpu.pipeline_mode<synchronous>, transform_indices = @transform_5, window_bounds = array<i64: 1, 128>}, {pipeline_mode = #tpu.pipeline_mode<synchronous>, transform_indices = @transform_6, window_bounds = array<i64: 1, 128>}, {pipeline_mode = #tpu.pipeline_mode<synchronous>, transform_indices = @transform_7, window_bounds = array<i64: 128, 128>}, {pipeline_mode = #tpu.pipeline_mode<synchronous>, transform_indices = @transform_8, window_bounds = array<i64: 1, 128>}, {pipeline_mode = #tpu.pipeline_mode<synchronous>, transform_indices = @transform_9, window_bounds = array<i64: 1, 128>}, {transform_indices = @transform_10, window_bounds = array<i64: 8, 128>}]} {
    %c8_i32 = arith.constant 8 : i32
    %0 = arith.muli %arg1, %c8_i32 : i32
    %1 = tpu.assume_multiple %0, 8 : i32
    %c0_i32 = arith.constant 0 : i32
    %2 = arith.cmpi eq, %arg0, %c0_i32 : i32
    %3 = arith.extui %2 : i1 to i32
    %c0_i32_0 = arith.constant 0 : i32
    %4 = arith.cmpi ne, %3, %c0_i32_0 : i32
    scf.if %4 {
      %c0_i32_4 = arith.constant 0 : i32
      %14 = arith.cmpi eq, %arg1, %c0_i32_4 : i32
      %15 = arith.extui %14 : i1 to i32
      %c0_i32_5 = arith.constant 0 : i32
      %16 = arith.cmpi ne, %15, %c0_i32_5 : i32
      scf.if %16 {
        %cst_20 = arith.constant 0.000000e+00 : f32
        %34 = vector.broadcast %cst_20 : f32 to vector<1x128xf32>
        %c0_21 = arith.constant 0 : index
        %c0_22 = arith.constant 0 : index
        %35 = vector.load %arg14[%c0_21, %c0_22] : memref<1x128xf32, #tpu.memory_space<vmem>>, vector<1x128xf32>
        tpu.vector_store %arg14[%c0_21, %c0_22], %34 {strides = array<i32>} : memref<1x128xf32, #tpu.memory_space<vmem>>, vector<1x128xf32>,
        %cst_23 = arith.constant 0.000000e+00 : f32
        %36 = vector.broadcast %cst_23 : f32 to vector<1x128xf32>
        %c0_24 = arith.constant 0 : index
        %c0_25 = arith.constant 0 : index
        %37 = vector.load %arg15[%c0_24, %c0_25] : memref<1x128xf32, #tpu.memory_space<vmem>>, vector<1x128xf32>
        tpu.vector_store %arg15[%c0_24, %c0_25], %36 {strides = array<i32>} : memref<1x128xf32, #tpu.memory_space<vmem>>, vector<1x128xf32>,
      } else {
      }
      %c0 = arith.constant 0 : index
      %c0_6 = arith.constant 0 : index
      %17 = vector.load %arg2[%c0, %c0_6] : memref<8x128xf32, #tpu.memory_space<vmem>>, vector<8x128xf32>
      %18 = arith.truncf %17 : vector<8x128xf32> to vector<8x128xbf16>
      %c0_7 = arith.constant 0 : index
      %c0_8 = arith.constant 0 : index
      %19 = vector.load %arg3[%c0_7, %c0_8] : memref<128x128xbf16, #tpu.memory_space<vmem>>, vector<128x128xbf16>
      %cst = arith.constant dense<0.000000e+00> : vector<8x128xf32>
      %20 = tpu.matmul %18, %19, %cst {dimension_numbers = #tpu.dot_dimension_numbers<[1], [0], [0], [1], [0, 0, 1, 1], [], []>} : vector<8x128xbf16>, vector<128x128xbf16>, vector<8x128xf32> -> vector<8x128xf32>
      %21 = arith.index_cast %1 : i32 to index
      %c0_9 = arith.constant 0 : index
      %22 = vector.load %arg13[%21, %c0_9] : memref<8x128xf32, #tpu.memory_space<vmem>>, vector<8x128xf32>
      tpu.vector_store %arg13[%21, %c0_9], %20 {strides = array<i32>} : memref<8x128xf32, #tpu.memory_space<vmem>>, vector<8x128xf32>,
      %c0_10 = arith.constant 0 : index
      %c0_11 = arith.constant 0 : index
      %23 = vector.load %arg14[%c0_10, %c0_11] : memref<1x128xf32, #tpu.memory_space<vmem>>, vector<1x128xf32>
      %cst_12 = arith.constant dense<0.000000e+00> : vector<128xf32>
      %24 = vector.multi_reduction <add>, %20, %cst_12 [0] : vector<8x128xf32> to vector<128xf32>
      %25 = vector.shape_cast %24 : vector<128xf32> to vector<1x128xf32>
      %26 = arith.addf %23, %25 : vector<1x128xf32>
      %c0_13 = arith.constant 0 : index
      %c0_14 = arith.constant 0 : index
      %27 = vector.load %arg14[%c0_13, %c0_14] : memref<1x128xf32, #tpu.memory_space<vmem>>, vector<1x128xf32>
      tpu.vector_store %arg14[%c0_13, %c0_14], %26 {strides = array<i32>} : memref<1x128xf32, #tpu.memory_space<vmem>>, vector<1x128xf32>,
      %c0_15 = arith.constant 0 : index
      %c0_16 = arith.constant 0 : index
      %28 = vector.load %arg15[%c0_15, %c0_16] : memref<1x128xf32, #tpu.memory_space<vmem>>, vector<1x128xf32>
      %29 = arith.mulf %20, %20 : vector<8x128xf32>
      %cst_17 = arith.constant dense<0.000000e+00> : vector<128xf32>
      %30 = vector.multi_reduction <add>, %29, %cst_17 [0] : vector<8x128xf32> to vector<128xf32>
      %31 = vector.shape_cast %30 : vector<128xf32> to vector<1x128xf32>
      %32 = arith.addf %28, %31 : vector<1x128xf32>
      %c0_18 = arith.constant 0 : index
      %c0_19 = arith.constant 0 : index
      %33 = vector.load %arg15[%c0_18, %c0_19] : memref<1x128xf32, #tpu.memory_space<vmem>>, vector<1x128xf32>
      tpu.vector_store %arg15[%c0_18, %c0_19], %32 {strides = array<i32>} : memref<1x128xf32, #tpu.memory_space<vmem>>, vector<1x128xf32>,
    } else {
    }
    %c1_i32 = arith.constant 1 : i32
    %5 = arith.cmpi eq, %arg0, %c1_i32 : i32
    %6 = arith.extui %5 : i1 to i32
    %c0_i32_1 = arith.constant 0 : i32
    %7 = arith.cmpi ne, %6, %c0_i32_1 : i32
    scf.if %7 {
      %c0_i32_4 = arith.constant 0 : i32
      %14 = arith.cmpi eq, %arg1, %c0_i32_4 : i32
      %15 = arith.extui %14 : i1 to i32
      %c0_i32_5 = arith.constant 0 : i32
      %16 = arith.cmpi ne, %15, %c0_i32_5 : i32
      scf.if %16 {
        %c0_24 = arith.constant 0 : index
        %c0_25 = arith.constant 0 : index
        %43 = vector.load %arg14[%c0_24, %c0_25] : memref<1x128xf32, #tpu.memory_space<vmem>>, vector<1x128xf32>
        %cst_26 = arith.constant 1.250000e-01 : f32
        %44 = vector.broadcast %cst_26 : f32 to vector<1x128xf32>
        %45 = arith.mulf %43, %44 : vector<1x128xf32>
        %c0_27 = arith.constant 0 : index
        %c0_28 = arith.constant 0 : index
        %46 = vector.load %arg15[%c0_27, %c0_28] : memref<1x128xf32, #tpu.memory_space<vmem>>, vector<1x128xf32>
        %cst_29 = arith.constant 1.250000e-01 : f32
        %47 = vector.broadcast %cst_29 : f32 to vector<1x128xf32>
        %48 = arith.mulf %46, %47 : vector<1x128xf32>
        %49 = arith.mulf %45, %45 : vector<1x128xf32>
        %50 = arith.subf %48, %49 : vector<1x128xf32>
        %cst_30 = arith.constant 0.000000e+00 : f32
        %51 = vector.broadcast %cst_30 : f32 to vector<1x128xf32>
        %52 = arith.maximumf %50, %51 : vector<1x128xf32>
        %c0_31 = arith.constant 0 : index
        %c0_32 = arith.constant 0 : index
        %53 = vector.load %arg4[%c0_31, %c0_32] : memref<1x128xf32, #tpu.memory_space<vmem>>, vector<1x128xf32>
        %cst_33 = arith.constant 9.99999974E-6 : f32
        %54 = vector.broadcast %cst_33 : f32 to vector<1x128xf32>
        %55 = arith.addf %52, %54 : vector<1x128xf32>
        %56 = math.rsqrt %55 : vector<1x128xf32>
        %57 = arith.mulf %53, %56 : vector<1x128xf32>
        %c0_34 = arith.constant 0 : index
        %c0_35 = arith.constant 0 : index
        %58 = vector.load %arg16[%c0_34, %c0_35] : memref<1x128xf32, #tpu.memory_space<vmem>>, vector<1x128xf32>
        tpu.vector_store %arg16[%c0_34, %c0_35], %57 {strides = array<i32>} : memref<1x128xf32, #tpu.memory_space<vmem>>, vector<1x128xf32>,
        %c0_36 = arith.constant 0 : index
        %c0_37 = arith.constant 0 : index
        %59 = vector.load %arg5[%c0_36, %c0_37] : memref<1x128xf32, #tpu.memory_space<vmem>>, vector<1x128xf32>
        %60 = arith.mulf %45, %57 : vector<1x128xf32>
        %61 = arith.subf %59, %60 : vector<1x128xf32>
        %c0_38 = arith.constant 0 : index
        %c0_39 = arith.constant 0 : index
        %62 = vector.load %arg17[%c0_38, %c0_39] : memref<1x128xf32, #tpu.memory_space<vmem>>, vector<1x128xf32>
        tpu.vector_store %arg17[%c0_38, %c0_39], %61 {strides = array<i32>} : memref<1x128xf32, #tpu.memory_space<vmem>>, vector<1x128xf32>,
        %cst_40 = arith.constant 0.000000e+00 : f32
        %63 = vector.broadcast %cst_40 : f32 to vector<1x128xf32>
        %c0_41 = arith.constant 0 : index
        %c0_42 = arith.constant 0 : index
        %64 = vector.load %arg14[%c0_41, %c0_42] : memref<1x128xf32, #tpu.memory_space<vmem>>, vector<1x128xf32>
        tpu.vector_store %arg14[%c0_41, %c0_42], %63 {strides = array<i32>} : memref<1x128xf32, #tpu.memory_space<vmem>>, vector<1x128xf32>,
        %cst_43 = arith.constant 0.000000e+00 : f32
        %65 = vector.broadcast %cst_43 : f32 to vector<1x128xf32>
        %c0_44 = arith.constant 0 : index
        %c0_45 = arith.constant 0 : index
        %66 = vector.load %arg15[%c0_44, %c0_45] : memref<1x128xf32, #tpu.memory_space<vmem>>, vector<1x128xf32>
        tpu.vector_store %arg15[%c0_44, %c0_45], %65 {strides = array<i32>} : memref<1x128xf32, #tpu.memory_space<vmem>>, vector<1x128xf32>,
      } else {
      }
      %17 = arith.index_cast %1 : i32 to index
      %c0 = arith.constant 0 : index
      %18 = vector.load %arg13[%17, %c0] : memref<8x128xf32, #tpu.memory_space<vmem>>, vector<8x128xf32>
      %c0_6 = arith.constant 0 : index
      %c0_7 = arith.constant 0 : index
      %19 = vector.load %arg16[%c0_6, %c0_7] : memref<1x128xf32, #tpu.memory_space<vmem>>, vector<1x128xf32>
      %20 = vector.broadcast %19 : vector<1x128xf32> to vector<8x128xf32>
      %21 = arith.mulf %18, %20 : vector<8x128xf32>
      %c0_8 = arith.constant 0 : index
      %c0_9 = arith.constant 0 : index
      %22 = vector.load %arg17[%c0_8, %c0_9] : memref<1x128xf32, #tpu.memory_space<vmem>>, vector<1x128xf32>
      %23 = vector.broadcast %22 : vector<1x128xf32> to vector<8x128xf32>
      %24 = arith.addf %21, %23 : vector<8x128xf32>
      %cst = arith.constant 0.000000e+00 : f32
      %25 = vector.broadcast %cst : f32 to vector<8x128xf32>
      %26 = arith.maximumf %24, %25 : vector<8x128xf32>
      %27 = arith.truncf %26 : vector<8x128xf32> to vector<8x128xbf16>
      %c0_10 = arith.constant 0 : index
      %c0_11 = arith.constant 0 : index
      %28 = vector.load %arg6[%c0_10, %c0_11] : memref<128x128xbf16, #tpu.memory_space<vmem>>, vector<128x128xbf16>
      %cst_12 = arith.constant dense<0.000000e+00> : vector<8x128xf32>
      %29 = tpu.matmul %27, %28, %cst_12 {dimension_numbers = #tpu.dot_dimension_numbers<[1], [0], [0], [1], [0, 0, 1, 1], [], []>} : vector<8x128xbf16>, vector<128x128xbf16>, vector<8x128xf32> -> vector<8x128xf32>
      %30 = arith.index_cast %1 : i32 to index
      %c0_13 = arith.constant 0 : index
      %31 = vector.load %arg13[%30, %c0_13] : memref<8x128xf32, #tpu.memory_space<vmem>>, vector<8x128xf32>
      tpu.vector_store %arg13[%30, %c0_13], %29 {strides = array<i32>} : memref<8x128xf32, #tpu.memory_space<vmem>>, vector<8x128xf32>,
      %c0_14 = arith.constant 0 : index
      %c0_15 = arith.constant 0 : index
      %32 = vector.load %arg14[%c0_14, %c0_15] : memref<1x128xf32, #tpu.memory_space<vmem>>, vector<1x128xf32>
      %cst_16 = arith.constant dense<0.000000e+00> : vector<128xf32>
      %33 = vector.multi_reduction <add>, %29, %cst_16 [0] : vector<8x128xf32> to vector<128xf32>
      %34 = vector.shape_cast %33 : vector<128xf32> to vector<1x128xf32>
      %35 = arith.addf %32, %34 : vector<1x128xf32>
      %c0_17 = arith.constant 0 : index
      %c0_18 = arith.constant 0 : index
      %36 = vector.load %arg14[%c0_17, %c0_18] : memref<1x128xf32, #tpu.memory_space<vmem>>, vector<1x128xf32>
      tpu.vector_store %arg14[%c0_17, %c0_18], %35 {strides = array<i32>} : memref<1x128xf32, #tpu.memory_space<vmem>>, vector<1x128xf32>,
      %c0_19 = arith.constant 0 : index
      %c0_20 = arith.constant 0 : index
      %37 = vector.load %arg15[%c0_19, %c0_20] : memref<1x128xf32, #tpu.memory_space<vmem>>, vector<1x128xf32>
      %38 = arith.mulf %29, %29 : vector<8x128xf32>
      %cst_21 = arith.constant dense<0.000000e+00> : vector<128xf32>
      %39 = vector.multi_reduction <add>, %38, %cst_21 [0] : vector<8x128xf32> to vector<128xf32>
      %40 = vector.shape_cast %39 : vector<128xf32> to vector<1x128xf32>
      %41 = arith.addf %37, %40 : vector<1x128xf32>
      %c0_22 = arith.constant 0 : index
      %c0_23 = arith.constant 0 : index
      %42 = vector.load %arg15[%c0_22, %c0_23] : memref<1x128xf32, #tpu.memory_space<vmem>>, vector<1x128xf32>
      tpu.vector_store %arg15[%c0_22, %c0_23], %41 {strides = array<i32>} : memref<1x128xf32, #tpu.memory_space<vmem>>, vector<1x128xf32>,
    } else {
    }
    %c2_i32 = arith.constant 2 : i32
    %8 = arith.cmpi eq, %arg0, %c2_i32 : i32
    %9 = arith.extui %8 : i1 to i32
    %c0_i32_2 = arith.constant 0 : i32
    %10 = arith.cmpi ne, %9, %c0_i32_2 : i32
    scf.if %10 {
      %c0_i32_4 = arith.constant 0 : i32
      %14 = arith.cmpi eq, %arg1, %c0_i32_4 : i32
      %15 = arith.extui %14 : i1 to i32
      %c0_i32_5 = arith.constant 0 : i32
      %16 = arith.cmpi ne, %15, %c0_i32_5 : i32
      scf.if %16 {
        %c0_24 = arith.constant 0 : index
        %c0_25 = arith.constant 0 : index
        %43 = vector.load %arg14[%c0_24, %c0_25] : memref<1x128xf32, #tpu.memory_space<vmem>>, vector<1x128xf32>
        %cst_26 = arith.constant 1.250000e-01 : f32
        %44 = vector.broadcast %cst_26 : f32 to vector<1x128xf32>
        %45 = arith.mulf %43, %44 : vector<1x128xf32>
        %c0_27 = arith.constant 0 : index
        %c0_28 = arith.constant 0 : index
        %46 = vector.load %arg15[%c0_27, %c0_28] : memref<1x128xf32, #tpu.memory_space<vmem>>, vector<1x128xf32>
        %cst_29 = arith.constant 1.250000e-01 : f32
        %47 = vector.broadcast %cst_29 : f32 to vector<1x128xf32>
        %48 = arith.mulf %46, %47 : vector<1x128xf32>
        %49 = arith.mulf %45, %45 : vector<1x128xf32>
        %50 = arith.subf %48, %49 : vector<1x128xf32>
        %cst_30 = arith.constant 0.000000e+00 : f32
        %51 = vector.broadcast %cst_30 : f32 to vector<1x128xf32>
        %52 = arith.maximumf %50, %51 : vector<1x128xf32>
        %c0_31 = arith.constant 0 : index
        %c0_32 = arith.constant 0 : index
        %53 = vector.load %arg7[%c0_31, %c0_32] : memref<1x128xf32, #tpu.memory_space<vmem>>, vector<1x128xf32>
        %cst_33 = arith.constant 9.99999974E-6 : f32
        %54 = vector.broadcast %cst_33 : f32 to vector<1x128xf32>
        %55 = arith.addf %52, %54 : vector<1x128xf32>
        %56 = math.rsqrt %55 : vector<1x128xf32>
        %57 = arith.mulf %53, %56 : vector<1x128xf32>
        %c0_34 = arith.constant 0 : index
        %c0_35 = arith.constant 0 : index
        %58 = vector.load %arg16[%c0_34, %c0_35] : memref<1x128xf32, #tpu.memory_space<vmem>>, vector<1x128xf32>
        tpu.vector_store %arg16[%c0_34, %c0_35], %57 {strides = array<i32>} : memref<1x128xf32, #tpu.memory_space<vmem>>, vector<1x128xf32>,
        %c0_36 = arith.constant 0 : index
        %c0_37 = arith.constant 0 : index
        %59 = vector.load %arg8[%c0_36, %c0_37] : memref<1x128xf32, #tpu.memory_space<vmem>>, vector<1x128xf32>
        %60 = arith.mulf %45, %57 : vector<1x128xf32>
        %61 = arith.subf %59, %60 : vector<1x128xf32>
        %c0_38 = arith.constant 0 : index
        %c0_39 = arith.constant 0 : index
        %62 = vector.load %arg17[%c0_38, %c0_39] : memref<1x128xf32, #tpu.memory_space<vmem>>, vector<1x128xf32>
        tpu.vector_store %arg17[%c0_38, %c0_39], %61 {strides = array<i32>} : memref<1x128xf32, #tpu.memory_space<vmem>>, vector<1x128xf32>,
        %cst_40 = arith.constant 0.000000e+00 : f32
        %63 = vector.broadcast %cst_40 : f32 to vector<1x128xf32>
        %c0_41 = arith.constant 0 : index
        %c0_42 = arith.constant 0 : index
        %64 = vector.load %arg14[%c0_41, %c0_42] : memref<1x128xf32, #tpu.memory_space<vmem>>, vector<1x128xf32>
        tpu.vector_store %arg14[%c0_41, %c0_42], %63 {strides = array<i32>} : memref<1x128xf32, #tpu.memory_space<vmem>>, vector<1x128xf32>,
        %cst_43 = arith.constant 0.000000e+00 : f32
        %65 = vector.broadcast %cst_43 : f32 to vector<1x128xf32>
        %c0_44 = arith.constant 0 : index
        %c0_45 = arith.constant 0 : index
        %66 = vector.load %arg15[%c0_44, %c0_45] : memref<1x128xf32, #tpu.memory_space<vmem>>, vector<1x128xf32>
        tpu.vector_store %arg15[%c0_44, %c0_45], %65 {strides = array<i32>} : memref<1x128xf32, #tpu.memory_space<vmem>>, vector<1x128xf32>,
      } else {
      }
      %17 = arith.index_cast %1 : i32 to index
      %c0 = arith.constant 0 : index
      %18 = vector.load %arg13[%17, %c0] : memref<8x128xf32, #tpu.memory_space<vmem>>, vector<8x128xf32>
      %c0_6 = arith.constant 0 : index
      %c0_7 = arith.constant 0 : index
      %19 = vector.load %arg16[%c0_6, %c0_7] : memref<1x128xf32, #tpu.memory_space<vmem>>, vector<1x128xf32>
      %20 = vector.broadcast %19 : vector<1x128xf32> to vector<8x128xf32>
      %21 = arith.mulf %18, %20 : vector<8x128xf32>
      %c0_8 = arith.constant 0 : index
      %c0_9 = arith.constant 0 : index
      %22 = vector.load %arg17[%c0_8, %c0_9] : memref<1x128xf32, #tpu.memory_space<vmem>>, vector<1x128xf32>
      %23 = vector.broadcast %22 : vector<1x128xf32> to vector<8x128xf32>
      %24 = arith.addf %21, %23 : vector<8x128xf32>
      %cst = arith.constant 0.000000e+00 : f32
      %25 = vector.broadcast %cst : f32 to vector<8x128xf32>
      %26 = arith.maximumf %24, %25 : vector<8x128xf32>
      %27 = arith.truncf %26 : vector<8x128xf32> to vector<8x128xbf16>
      %c0_10 = arith.constant 0 : index
      %c0_11 = arith.constant 0 : index
      %28 = vector.load %arg9[%c0_10, %c0_11] : memref<128x128xbf16, #tpu.memory_space<vmem>>, vector<128x128xbf16>
      %cst_12 = arith.constant dense<0.000000e+00> : vector<8x128xf32>
      %29 = tpu.matmul %27, %28, %cst_12 {dimension_numbers = #tpu.dot_dimension_numbers<[1], [0], [0], [1], [0, 0, 1, 1], [], []>} : vector<8x128xbf16>, vector<128x128xbf16>, vector<8x128xf32> -> vector<8x128xf32>
      %30 = arith.index_cast %1 : i32 to index
      %c0_13 = arith.constant 0 : index
      %31 = vector.load %arg13[%30, %c0_13] : memref<8x128xf32, #tpu.memory_space<vmem>>, vector<8x128xf32>
      tpu.vector_store %arg13[%30, %c0_13], %29 {strides = array<i32>} : memref<8x128xf32, #tpu.memory_space<vmem>>, vector<8x128xf32>,
      %c0_14 = arith.constant 0 : index
      %c0_15 = arith.constant 0 : index
      %32 = vector.load %arg14[%c0_14, %c0_15] : memref<1x128xf32, #tpu.memory_space<vmem>>, vector<1x128xf32>
      %cst_16 = arith.constant dense<0.000000e+00> : vector<128xf32>
      %33 = vector.multi_reduction <add>, %29, %cst_16 [0] : vector<8x128xf32> to vector<128xf32>
      %34 = vector.shape_cast %33 : vector<128xf32> to vector<1x128xf32>
      %35 = arith.addf %32, %34 : vector<1x128xf32>
      %c0_17 = arith.constant 0 : index
      %c0_18 = arith.constant 0 : index
      %36 = vector.load %arg14[%c0_17, %c0_18] : memref<1x128xf32, #tpu.memory_space<vmem>>, vector<1x128xf32>
      tpu.vector_store %arg14[%c0_17, %c0_18], %35 {strides = array<i32>} : memref<1x128xf32, #tpu.memory_space<vmem>>, vector<1x128xf32>,
      %c0_19 = arith.constant 0 : index
      %c0_20 = arith.constant 0 : index
      %37 = vector.load %arg15[%c0_19, %c0_20] : memref<1x128xf32, #tpu.memory_space<vmem>>, vector<1x128xf32>
      %38 = arith.mulf %29, %29 : vector<8x128xf32>
      %cst_21 = arith.constant dense<0.000000e+00> : vector<128xf32>
      %39 = vector.multi_reduction <add>, %38, %cst_21 [0] : vector<8x128xf32> to vector<128xf32>
      %40 = vector.shape_cast %39 : vector<128xf32> to vector<1x128xf32>
      %41 = arith.addf %37, %40 : vector<1x128xf32>
      %c0_22 = arith.constant 0 : index
      %c0_23 = arith.constant 0 : index
      %42 = vector.load %arg15[%c0_22, %c0_23] : memref<1x128xf32, #tpu.memory_space<vmem>>, vector<1x128xf32>
      tpu.vector_store %arg15[%c0_22, %c0_23], %41 {strides = array<i32>} : memref<1x128xf32, #tpu.memory_space<vmem>>, vector<1x128xf32>,
    } else {
    }
    %c3_i32 = arith.constant 3 : i32
    %11 = arith.cmpi eq, %arg0, %c3_i32 : i32
    %12 = arith.extui %11 : i1 to i32
    %c0_i32_3 = arith.constant 0 : i32
    %13 = arith.cmpi ne, %12, %c0_i32_3 : i32
    scf.if %13 {
      %c0_i32_4 = arith.constant 0 : i32
      %14 = arith.cmpi eq, %arg1, %c0_i32_4 : i32
      %15 = arith.extui %14 : i1 to i32
      %c0_i32_5 = arith.constant 0 : i32
      %16 = arith.cmpi ne, %15, %c0_i32_5 : i32
      scf.if %16 {
        %c0_12 = arith.constant 0 : index
        %c0_13 = arith.constant 0 : index
        %28 = vector.load %arg14[%c0_12, %c0_13] : memref<1x128xf32, #tpu.memory_space<vmem>>, vector<1x128xf32>
        %cst_14 = arith.constant 1.250000e-01 : f32
        %29 = vector.broadcast %cst_14 : f32 to vector<1x128xf32>
        %30 = arith.mulf %28, %29 : vector<1x128xf32>
        %c0_15 = arith.constant 0 : index
        %c0_16 = arith.constant 0 : index
        %31 = vector.load %arg15[%c0_15, %c0_16] : memref<1x128xf32, #tpu.memory_space<vmem>>, vector<1x128xf32>
        %cst_17 = arith.constant 1.250000e-01 : f32
        %32 = vector.broadcast %cst_17 : f32 to vector<1x128xf32>
        %33 = arith.mulf %31, %32 : vector<1x128xf32>
        %34 = arith.mulf %30, %30 : vector<1x128xf32>
        %35 = arith.subf %33, %34 : vector<1x128xf32>
        %cst_18 = arith.constant 0.000000e+00 : f32
        %36 = vector.broadcast %cst_18 : f32 to vector<1x128xf32>
        %37 = arith.maximumf %35, %36 : vector<1x128xf32>
        %c0_19 = arith.constant 0 : index
        %c0_20 = arith.constant 0 : index
        %38 = vector.load %arg10[%c0_19, %c0_20] : memref<1x128xf32, #tpu.memory_space<vmem>>, vector<1x128xf32>
        %cst_21 = arith.constant 9.99999974E-6 : f32
        %39 = vector.broadcast %cst_21 : f32 to vector<1x128xf32>
        %40 = arith.addf %37, %39 : vector<1x128xf32>
        %41 = math.rsqrt %40 : vector<1x128xf32>
        %42 = arith.mulf %38, %41 : vector<1x128xf32>
        %c0_22 = arith.constant 0 : index
        %c0_23 = arith.constant 0 : index
        %43 = vector.load %arg16[%c0_22, %c0_23] : memref<1x128xf32, #tpu.memory_space<vmem>>, vector<1x128xf32>
        tpu.vector_store %arg16[%c0_22, %c0_23], %42 {strides = array<i32>} : memref<1x128xf32, #tpu.memory_space<vmem>>, vector<1x128xf32>,
        %c0_24 = arith.constant 0 : index
        %c0_25 = arith.constant 0 : index
        %44 = vector.load %arg11[%c0_24, %c0_25] : memref<1x128xf32, #tpu.memory_space<vmem>>, vector<1x128xf32>
        %45 = arith.mulf %30, %42 : vector<1x128xf32>
        %46 = arith.subf %44, %45 : vector<1x128xf32>
        %c0_26 = arith.constant 0 : index
        %c0_27 = arith.constant 0 : index
        %47 = vector.load %arg17[%c0_26, %c0_27] : memref<1x128xf32, #tpu.memory_space<vmem>>, vector<1x128xf32>
        tpu.vector_store %arg17[%c0_26, %c0_27], %46 {strides = array<i32>} : memref<1x128xf32, #tpu.memory_space<vmem>>, vector<1x128xf32>,
        %cst_28 = arith.constant 0.000000e+00 : f32
        %48 = vector.broadcast %cst_28 : f32 to vector<1x128xf32>
        %c0_29 = arith.constant 0 : index
        %c0_30 = arith.constant 0 : index
        %49 = vector.load %arg14[%c0_29, %c0_30] : memref<1x128xf32, #tpu.memory_space<vmem>>, vector<1x128xf32>
        tpu.vector_store %arg14[%c0_29, %c0_30], %48 {strides = array<i32>} : memref<1x128xf32, #tpu.memory_space<vmem>>, vector<1x128xf32>,
        %cst_31 = arith.constant 0.000000e+00 : f32
        %50 = vector.broadcast %cst_31 : f32 to vector<1x128xf32>
        %c0_32 = arith.constant 0 : index
        %c0_33 = arith.constant 0 : index
        %51 = vector.load %arg15[%c0_32, %c0_33] : memref<1x128xf32, #tpu.memory_space<vmem>>, vector<1x128xf32>
        tpu.vector_store %arg15[%c0_32, %c0_33], %50 {strides = array<i32>} : memref<1x128xf32, #tpu.memory_space<vmem>>, vector<1x128xf32>,
      } else {
      }
      %17 = arith.index_cast %1 : i32 to index
      %c0 = arith.constant 0 : index
      %18 = vector.load %arg13[%17, %c0] : memref<8x128xf32, #tpu.memory_space<vmem>>, vector<8x128xf32>
      %c0_6 = arith.constant 0 : index
      %c0_7 = arith.constant 0 : index
      %19 = vector.load %arg16[%c0_6, %c0_7] : memref<1x128xf32, #tpu.memory_space<vmem>>, vector<1x128xf32>
      %20 = vector.broadcast %19 : vector<1x128xf32> to vector<8x128xf32>
      %21 = arith.mulf %18, %20 : vector<8x128xf32>
      %c0_8 = arith.constant 0 : index
      %c0_9 = arith.constant 0 : index
      %22 = vector.load %arg17[%c0_8, %c0_9] : memref<1x128xf32, #tpu.memory_space<vmem>>, vector<1x128xf32>
      %23 = vector.broadcast %22 : vector<1x128xf32> to vector<8x128xf32>
      %24 = arith.addf %21, %23 : vector<8x128xf32>
      %cst = arith.constant 0.000000e+00 : f32
      %25 = vector.broadcast %cst : f32 to vector<8x128xf32>
      %26 = arith.maximumf %24, %25 : vector<8x128xf32>
      %c0_10 = arith.constant 0 : index
      %c0_11 = arith.constant 0 : index
      %27 = vector.load %arg12[%c0_10, %c0_11] : memref<8x128xf32, #tpu.memory_space<vmem>>, vector<8x128xf32>
      tpu.vector_store %arg12[%c0_10, %c0_11], %26 {strides = array<i32>} : memref<8x128xf32, #tpu.memory_space<vmem>>, vector<8x128xf32>,
    } else {
    }
    return
  }
  func.func @transform_0(%arg0: i32, %arg1: i32) -> (i32, i32) {
    %c0_i32 = arith.constant 0 : i32
    %0 = arith.cmpi eq, %arg0, %c0_i32 : i32
    %c0_i32_0 = arith.constant 0 : i32
    %1 = arith.select %0, %arg1, %c0_i32_0 : i32
    %c0_i32_1 = arith.constant 0 : i32
    %c0_i32_2 = arith.constant 0 : i32
    return %1, %c0_i32_1 : i32, i32
  }
  func.func @transform_1(%arg0: i32, %arg1: i32) -> (i32, i32) {
    %c0_i32 = arith.constant 0 : i32
    %c0_i32_0 = arith.constant 0 : i32
    %c0_i32_1 = arith.constant 0 : i32
    return %c0_i32, %c0_i32_0 : i32, i32
  }
  func.func @transform_2(%arg0: i32, %arg1: i32) -> (i32, i32) {
    %c0_i32 = arith.constant 0 : i32
    %c0_i32_0 = arith.constant 0 : i32
    %c0_i32_1 = arith.constant 0 : i32
    return %c0_i32, %c0_i32_0 : i32, i32
  }
  func.func @transform_3(%arg0: i32, %arg1: i32) -> (i32, i32) {
    %c0_i32 = arith.constant 0 : i32
    %c0_i32_0 = arith.constant 0 : i32
    %c0_i32_1 = arith.constant 0 : i32
    return %c0_i32, %c0_i32_0 : i32, i32
  }
  func.func @transform_4(%arg0: i32, %arg1: i32) -> (i32, i32) {
    %c0_i32 = arith.constant 0 : i32
    %c0_i32_0 = arith.constant 0 : i32
    %c0_i32_1 = arith.constant 0 : i32
    return %c0_i32, %c0_i32_0 : i32, i32
  }
  func.func @transform_5(%arg0: i32, %arg1: i32) -> (i32, i32) {
    %c0_i32 = arith.constant 0 : i32
    %c0_i32_0 = arith.constant 0 : i32
    %c0_i32_1 = arith.constant 0 : i32
    return %c0_i32, %c0_i32_0 : i32, i32
  }
  func.func @transform_6(%arg0: i32, %arg1: i32) -> (i32, i32) {
    %c0_i32 = arith.constant 0 : i32
    %c0_i32_0 = arith.constant 0 : i32
    %c0_i32_1 = arith.constant 0 : i32
    return %c0_i32, %c0_i32_0 : i32, i32
  }
  func.func @transform_7(%arg0: i32, %arg1: i32) -> (i32, i32) {
    %c0_i32 = arith.constant 0 : i32
    %c0_i32_0 = arith.constant 0 : i32
    %c0_i32_1 = arith.constant 0 : i32
    return %c0_i32, %c0_i32_0 : i32, i32
  }
  func.func @transform_8(%arg0: i32, %arg1: i32) -> (i32, i32) {
    %c0_i32 = arith.constant 0 : i32
    %c0_i32_0 = arith.constant 0 : i32
    %c0_i32_1 = arith.constant 0 : i32
    return %c0_i32, %c0_i32_0 : i32, i32
  }
  func.func @transform_9(%arg0: i32, %arg1: i32) -> (i32, i32) {
    %c0_i32 = arith.constant 0 : i32
    %c0_i32_0 = arith.constant 0 : i32
    %c0_i32_1 = arith.constant 0 : i32
    return %c0_i32, %c0_i32_0 : i32, i32
  }
  func.func @transform_10(%arg0: i32, %arg1: i32) -> (i32, i32) {
    %c3_i32 = arith.constant 3 : i32
    %0 = arith.cmpi eq, %arg0, %c3_i32 : i32
    %c0_i32 = arith.constant 0 : i32
    %1 = arith.select %0, %arg1, %c0_i32 : i32
    %c0_i32_0 = arith.constant 0 : i32
    %c0_i32_1 = arith.constant 0 : i32
    return %1, %c0_i32_0 : i32, i32
  }
}

</mosaic_0001>

<bundles_post_ra>
// kernel: tpu_custom_call.1
= control target key start
LH: loop header
LB: loop body
LE: loop exit
PB: predicated region body
PF: predicated region fallthrough
CT: control target
= control target key end

     0   :  { %s1809_s0 = inlined_call_operand.hbm [shape: f32[8,128], index: 0, kind: input, shape index: {}]   ;;  %s1810_s1 = inlined_call_operand.hbm [shape: bf16[128,128], index: 1, kind: input, shape index: {}]   ;;  %s1811_s2 = inlined_call_operand.vmem [shape: f32[1,128], index: 2, kind: input, shape index: {}]   ;;  %s1812_s3 = inlined_call_operand.vmem [shape: f32[1,128], index: 3, kind: input, shape index: {}]   ;;  %s1813_s4 = inlined_call_operand.hbm [shape: bf16[128,128], index: 4, kind: input, shape index: {}]   ;;  %s1814_s5 = inlined_call_operand.vmem [shape: f32[1,128], index: 5, kind: input, shape index: {}]   ;;  %s1815_s6 = inlined_call_operand.vmem [shape: f32[1,128], index: 6, kind: input, shape index: {}]   ;;  %s1816_s7 = inlined_call_operand.hbm [shape: bf16[128,128], index: 7, kind: input, shape index: {}]   ;;  %s1817_s8 = inlined_call_operand.vmem [shape: f32[1,128], index: 8, kind: input, shape index: {}]   ;;  %s1818_s9 = inlined_call_operand.vmem [shape: f32[1,128], index: 9, kind: input, shape index: {}]   ;;  %s1819_s10 = inlined_call_operand.hbm [shape: f32[8,128], index: 10, kind: output, shape index: {}]  }
   0x1   :  { %1826 = sst [smem:[#allocation22_spill]] %s1819_s10 }
   0x2   :  { %15 = vsyncpa [#allocation8], 0 }
   0x3   :  { %17 = vsyncpa [#allocation8 + $0x1], 0 }
   0x4   :  { %18 = vsyncpa [#allocation11], 0 }
   0x5   :  { %19 = vsyncpa [#allocation14], 0 }
   0x6   :  { %20 = vsyncpa [#allocation9], 0 }
   0x7   :  { %22 = vsyncpa [#allocation9 + $0x1], 0  ;;  %s1604_s13 = smov 0   ;;  %s1606_s14 = smov 0  }
   0x8   :  { %s1608_s15 = smov 0  }
   0x9 LB: > { %1827 = sst [smem:[#allocation20_spill]] %s1529_s14  ;;  %s1823_s16 = sadd.s32 4294967295, %s1533_s15   ;;  %s1533_s15 = sphi %s1608_s15, %s28_s15   ;;  %s1529_s14 = sphi %s1606_s14, %s1842_s14   ;;  %s1525_s13 = sphi %s1604_s13, %s1841_s13  }
   0xa   : > { %s40_s18 = sadd.s32 1, %s1529_s14  ;;  %p1103_p0 = scmp.ge.s32.totalorder %s1533_s15, 1 }
   0xb   : > { %p42_p1 = scmp.ge.s32.totalorder %s40_s18, 4  ;;  %p294_p2 = scmp.lt.s32.totalorder %s1533_s15, 5 }
   0xc   : > { %p1626_p3 = scmp.eq.s32.totalorder %s1823_s16, 0  ;;  %s1535_s21 = smov [#allocation10]  }
   0xd   : > { %s1844_s18 = smov (%p42_p1, %s40_s18), 0  ;;  %p1632_p4 = pnand %p1103_p0, %p294_p2 }
   0xe   : > { %s1828_s19 = scalar_select %p1626_p3, 1, 0 }
   0xf   : > { %1829 = sst [smem:[#allocation21_spill]] %s1844_s18  ;;  %s306_s22 = sshll.u32 %s1535_s21, 4  ;;  %s307_s22 = int_to_ptr.vmem [resolvable:$true] %s306_s22 }
  0x10   : > { %s1830_s20 = scalar_select %p1632_p4, 1, 0 }
  0x11   : > { %p1259_p5 = pneg %p1632_p4  ;;  %s1536_s24 = smov [#allocation12]  }
  0x12   : > { %s325_s25 = sshll.u32 %s1536_s24, 4  ;;  %s1357_s28 = scalar_lea.hbm %s1810_s1, 1024  ;;  %s326_s25 = int_to_ptr.vmem [resolvable:$true] %s325_s25 }
  0x13   : > { %p1640_p6 = pnand %p1626_p3, %p1259_p5  ;;  %p1358_p7 = scmp.ne.s32.totalorder %s1810_s1, %s1357_s28 }
  0x14   : > { %p1364_p11 = scmp.lt.u32.totalorder %s1357_s28, %s1810_s1 }
  0x15   : > { %p1652_p8 = pneg %p1640_p6 }
  0x17   : > { %p1360_p9 = pnand %p1652_p8, %p1358_p7 }
  0x19   : > { %p1361_p10 = pneg %p1360_p9 }
  0x1b   : > { %p1366_p12 = pnand %p1364_p11, %p1361_p10 }
  0x1d   : > { %1369 = shalt.err (!%p1366_p12)
}
  0x1e   : > { %s1370_s24 = scalar_lea.vmem %s307_s22, 1024  ;;  %p1378_p2 = scmp.lt.s32.totalorder %s307_s22, %s307_s22 }
  0x1f   : > { %p1371_p13 = scmp.ne.s32.totalorder %s307_s22, %s1370_s24  ;;  %p1379_p5 = scmp.lt.s32.totalorder %s1370_s24, %s1370_s24 }
  0x21   : > { %p1373_p0 = pnand %p1371_p13, %p1652_p8  ;;  %p1380_p3 = por %p1379_p5, %p1378_p2 }
  0x23   : > { %p1374_p1 = pneg %p1373_p0 }
  0x25   : > { %p1381_p4 = pnand %p1380_p3, %p1374_p1 }
  0x27   : > { %1384 = shalt.err (!%p1381_p4)
}
  0x28   : > { %s1537_s26 = smov 64   ;;  %s1538_s27 = smov 4  }
  0x29   : > { %1262 = dma.hbm_to_vmem [thread:$0]  (!%p1640_p6), %s1810_s1, 1024, %s307_s22, [#allocation11], %s1537_s26, %s1537_s26, %s1538_s27  }
  0x2a   : > { %s1539_s30 = smov [#allocation13]   ;;  %s1385_s17 = scalar_lea.hbm %s1813_s4, 1024 }
  0x2b   : > { %s344_s12 = sshll.u32 %s1539_s30, 4  ;;  %p1386_p3 = scmp.ne.s32.totalorder %s1813_s4, %s1385_s17  ;;  %s345_s12 = int_to_ptr.vmem [resolvable:$true] %s344_s12 }
  0x2c   : > { %p1392_p9 = scmp.lt.u32.totalorder %s1385_s17, %s1813_s4 }
  0x2d   : > { %p1388_p4 = pnand %p1386_p3, %p1652_p8 }
  0x2f   : > { %p1389_p7 = pneg %p1388_p4 }
  0x31   : > { %p1394_p10 = pnand %p1392_p9, %p1389_p7 }
  0x33   : > { %1397 = shalt.err (!%p1394_p10)
}
  0x34   : > { %s1398_s22 = scalar_lea.vmem %s326_s25, 1024  ;;  %p1406_p0 = scmp.lt.s32.totalorder %s326_s25, %s326_s25 }
  0x35   : > { %p1399_p11 = scmp.ne.s32.totalorder %s326_s25, %s1398_s22  ;;  %p1407_p1 = scmp.lt.s32.totalorder %s1398_s22, %s1398_s22 }
  0x37   : > { %p1401_p12 = pnand %p1399_p11, %p1652_p8  ;;  %p1408_p2 = por %p1407_p1, %p1406_p0 }
  0x39   : > { %p1402_p13 = pneg %p1401_p12 }
  0x3b   : > { %p1409_p5 = pnand %p1408_p2, %p1402_p13 }
  0x3d   : > { %1412 = shalt.err (!%p1409_p5)
}
  0x3e   : > { %1265 = dma.hbm_to_vmem [thread:$0]  (!%p1640_p6), %s1813_s4, 1024, %s326_s25, [#allocation11], %s1537_s26, %s1537_s26, %s1538_s27  }
  0x3f   : > { %s1413_s18 = scalar_lea.hbm %s1816_s7, 1024 }
  0x40   : > { %p1414_p4 = scmp.ne.s32.totalorder %s1816_s7, %s1413_s18  ;;  %p1420_p10 = scmp.lt.u32.totalorder %s1413_s18, %s1816_s7 }
  0x42   : > { %p1416_p7 = pnand %p1414_p4, %p1652_p8 }
  0x44   : > { %p1417_p9 = pneg %p1416_p7 }
  0x46   : > { %p1422_p11 = pnand %p1420_p10, %p1417_p9 }
  0x48   : > { %1425 = shalt.err (!%p1422_p11)
}
  0x49   : > { %s1426_s25 = scalar_lea.vmem %s345_s12, 1024  ;;  %p1434_p1 = scmp.lt.s32.totalorder %s345_s12, %s345_s12 }
  0x4a   : > { %p1427_p12 = scmp.ne.s32.totalorder %s345_s12, %s1426_s25  ;;  %p1435_p2 = scmp.lt.s32.totalorder %s1426_s25, %s1426_s25 }
  0x4c   : > { %p1429_p13 = pnand %p1427_p12, %p1652_p8  ;;  %p1436_p5 = por %p1435_p2, %p1434_p1 }
  0x4e   : > { %p1430_p0 = pneg %p1429_p13 }
  0x50   : > { %p1437_p3 = pnand %p1436_p5, %p1430_p0 }
  0x52   : > { %1440 = shalt.err (!%p1437_p3)
}
  0x53   : > { %1268 = dma.hbm_to_vmem [thread:$0]  (!%p1640_p6), %s1816_s7, 1024, %s345_s12, [#allocation14], %s1537_s26, %s1537_s26, %s1538_s27  }
  0x54   : > { %p1281_p4 = scmp.eq.s32.totalorder %s1533_s15, 0  ;;  %s1540_s11 = smov [#allocation7]  }
  0x55   : > { %s377_s10 = sshll.u32 %s1540_s11, 4  ;;  %p1833_p8 = scmp.lt.s32.totalorder %s1533_s15, 4  ;;  %s378_s10 = int_to_ptr.vmem [resolvable:$true] %s377_s10 }
  0x56   : > { %s1441_s17 = scalar_lea.hbm %s1809_s0, 128 }
  0x57   : > { %p1717_p7 = pnand %p1281_p4, %p1833_p8  ;;  %p1442_p3 = scmp.ne.s32.totalorder %s1809_s0, %s1441_s17 }
  0x58   : > { %p1448_p11 = scmp.lt.u32.totalorder %s1441_s17, %s1809_s0 }
  0x59   : > { %p1443_p6 = pneg %p1717_p7 }
  0x5b   : > { %p1444_p9 = pnand %p1443_p6, %p1442_p3 }
  0x5d   : > { %p1445_p10 = pneg %p1444_p9 }
  0x5f   : > { %p1450_p12 = pnand %p1448_p11, %p1445_p10 }
  0x61   : > { %1453 = shalt.err (!%p1450_p12)
}
  0x62   : > { %s1454_s12 = scalar_lea.vmem %s378_s10, 128  ;;  %s1461_s29 = scalar_lea.vmem %s378_s10, 256 }
  0x63   : > { %p1455_p13 = scmp.ne.s32.totalorder %s378_s10, %s1454_s12  ;;  %p1462_p2 = scmp.lt.s32.totalorder %s378_s10, %s378_s10 }
  0x64   : > { %p1463_p5 = scmp.lt.s32.totalorder %s1461_s29, %s1454_s12 }
  0x65   : > { %p1457_p0 = pnand %p1455_p13, %p1443_p6 }
  0x66   : > { %p1464_p4 = por %p1463_p5, %p1462_p2 }
  0x67   : > { %p1458_p1 = pneg %p1457_p0 }
  0x69   : > { %p1465_p8 = pnand %p1464_p4, %p1458_p1 }
  0x6b   : > { %1468 = shalt.err (!%p1465_p8)
}
  0x6c   : > { %1272 = dma.hbm_to_vmem [thread:$0]  (!%p1717_p7), %s1809_s0, 128, %s378_s10, [#allocation8]  }
  0x6d   : > { %p1835_p3 = scmp.ne.s32.totalorder %s1830_s20, 0 }
  0x6e   : > { %p1836_p9 = scmp.ne.s32.totalorder (!%p1835_p3), %s1828_s19, 0 }
  0x6f   : > { %386 = sbr.rel (%p1835_p3) target bundleno = 1010 (0x3f2), region = 60 }
  0x76   : > { %1508 = dma.done.wait (%p1836_p9), [#allocation8], 128  }
  0x77   : > { %1510 = vsyncadd (%p1836_p9), [#allocation8], 4294967168 }
  0x78   : > { %1512 = dma.done.wait (%p1836_p9), [#allocation11], 2048  }
  0x79   : > { %1514 = vsyncadd (%p1836_p9), [#allocation11], 4294965248 }
  0x7a   : > { %1516 = dma.done.wait (%p1836_p9), [#allocation14], 1024  }
  0x7b   : > { %1518 = vsyncadd (%p1836_p9), [#allocation14], 4294966272  ;;  %p1114_p7 = scmp.ne.s32.totalorder %s1525_s13, 0 }
  0x7c   : > { %v1327_v0 = vld [vmem:[#allocation10] sm:$0xff] (!%p1114_p7)   ;;  %v1541_v1 = vmov (!%p1114_p7), 0.0   ;;  %v1328_v2 = vld [vmem:[#allocation10 + $0x8] sm:$0xff] (!%p1114_p7)   ;;  %vm1542_vm0 = vmmov (!%p1114_p7), 0   ;;  %v1329_v3 = vld [vmem:[#allocation10 + $0x10] sm:$0xff] (!%p1114_p7)  }
  0x7d   : > { %450 = sbr.rel (%p1114_p7) target bundleno = 386 (0x182), region = 80  ;;  %1179 = vmatprep.subr.bf16.mxu0 (!%p1114_p7), %v1541_v1  ;;  %455 = vst [vmem:[#allocation3] sm:$0x1] (!%p1114_p7), %v1541_v1  ;;  %456 = vst [vmem:[#allocation4] sm:$0x1] (!%p1114_p7), %v1541_v1  ;;  %1195 = vmatprep.mubr.msk.bf16.mxu0 (!%p1114_p7), %vm1542_vm0, %v1541_v1  ;;  %v1330_v4 = vld [vmem:[#allocation10 + $0x18] sm:$0xff] (!%p1114_p7)  }
  0x7e   : > { %1180 = vmatpush3.bf16.msra.mxu0 (!%p1114_p7), %v1327_v0  ;;  %v1331_v5 = vld [vmem:[#allocation10 + $0x20] sm:$0xff] (!%p1114_p7)   ;;  %v1332_v6 = vld [vmem:[#allocation10 + $0x28] sm:$0xff] (!%p1114_p7)   ;;  %v1333_v7 = vld [vmem:[#allocation10 + $0x30] sm:$0xff] (!%p1114_p7)  }
  0x7f   : > { %1181 = vmatprep.subr.bf16.mxu0 (!%p1114_p7), %v1541_v1  ;;  %v1334_v8 = vld [vmem:[#allocation10 + $0x38] sm:$0xff] (!%p1114_p7)   ;;  %v457_v9 = vld [vmem:[#allocation7] sm:$0xff] (!%p1114_p7) }
  0x80   : > { %v458_v10 = vpack.c.bf16 (!%p1114_p7), %v457_v9, %v457_v9 }
  0x82   : > { %1182 = vmatpush3.bf16.msra.mxu0 (!%p1114_p7), %v1328_v2 }
  0x83   : > { %1183 = vmatprep.subr.bf16.mxu0 (!%p1114_p7), %v1541_v1 }
  0x84   : > { %v565_v25 = vld [vmem:[#allocation3] sm:$0x1]  ;;  %v574_v28 = vld [vmem:[#allocation4] sm:$0x1] }
  0x86   : > { %1184 = vmatpush3.bf16.msra.mxu0 %v1329_v3 }
  0x87   : > { %1185 = vmatprep.subr.bf16.mxu0 %v1541_v1 }
  0x8a   : > { %1186 = vmatpush3.bf16.msra.mxu0 %v1330_v4 }
  0x8b   : > { %1187 = vmatprep.subr.bf16.mxu0 %v1541_v1 }
  0x8e   : > { %1188 = vmatpush3.bf16.msra.mxu0 %v1331_v5 }
  0x8f   : > { %1189 = vmatprep.subr.bf16.mxu0 %v1541_v1 }
  0x92   : > { %1190 = vmatpush3.bf16.msra.mxu0 %v1332_v6 }
  0x93   : > { %1191 = vmatprep.subr.bf16.mxu0 %v1541_v1 }
  0x96   : > { %1192 = vmatpush3.bf16.msra.mxu0 %v1333_v7 }
  0x97   : > { %1193 = vmatprep.subr.bf16.mxu0 %v1541_v1 }
  0x9a   : > { %1194 = vmatpush3.bf16.msra.mxu0 %v1334_v8 }
  0x9d   : > { %1196 = vmatmul.mubr.bf16.vlgmr.msra.gmra.mrb[0].mxu0 %v458_v10 }
 0x170   : > { %v557_v11 = vpop.f32.mrb[0].mxu0 }
 0x171   : > { %564 = vst [vmem:[#allocation2] sm:$0xff] %v557_v11  ;;  %v566_v12 = vrot.slane %v557_v11, 4  ;;  %v575_v13 = vmul.f32 %v557_v11, %v557_v11  ;;  %v1197_v14 = vpop.f32.mrb[1].mxu0 }
 0x172   : > { %v560_v15 = vpop.f32.mrb[2].mxu0 }
 0x173   : > { %v567_v16 = vadd.f32 %v566_v12, %v557_v11  ;;  %v576_v17 = vrot.slane %v575_v13, 4  ;;  %v1198_v18 = vpop.f32.mrb[3].mxu0 }
 0x175   : > { %v568_v19 = vrot.slane %v567_v16, 2  ;;  %v577_v20 = vadd.f32 %v576_v17, %v575_v13 }
 0x177   : > { %v569_v21 = vadd.f32 %v568_v19, %v567_v16  ;;  %v578_v22 = vrot.slane %v577_v20, 2 }
 0x179   : > { %v570_v23 = vrot.slane %v569_v21, 1  ;;  %v579_v24 = vadd.f32 %v578_v22, %v577_v20 }
 0x17b   : > { %v571_v26 = vadd.f32 %v570_v23, %v569_v21  ;;  %v580_v27 = vrot.slane %v579_v24, 1 }
 0x17d   : > { %v572_v29 = vadd.f32 %v571_v26, %v565_v25  ;;  %v581_v30 = vadd.f32 %v580_v27, %v579_v24 }
 0x17f   : > { %573 = vst [vmem:[#allocation3] sm:$0x1] %v572_v29  ;;  %v582_v31 = vadd.f32 %v581_v30, %v574_v28 }
 0x181   : > { %583 = vst [vmem:[#allocation4] sm:$0x1] %v582_v31 }
 0x182 PF: > { %p1123_p6 = scmp.ne.s32.totalorder %s1525_s13, 1 }
 0x183   : > { %v1335_v32 = vld [vmem:[#allocation12] sm:$0xff] (!%p1123_p6)   ;;  %v1543_v33 = vmov (!%p1123_p6), 0.0   ;;  %v1336_v34 = vld [vmem:[#allocation12 + $0x8] sm:$0xff] (!%p1123_p6)   ;;  %vm1544_vm1 = vmmov (!%p1123_p6), 0   ;;  %v1337_v35 = vld [vmem:[#allocation12 + $0x10] sm:$0xff] (!%p1123_p6)  }
 0x184   : > { %587 = sbr.rel (%p1123_p6) target bundleno = 661 (0x295), region = 88  ;;  %1199 = vmatprep.subr.bf16.mxu0 (!%p1123_p6), %v1543_v33  ;;  %1215 = vmatprep.mubr.msk.bf16.mxu0 (!%p1123_p6), %vm1544_vm1, %v1543_v33  ;;  %v1338_v40 = vld [vmem:[#allocation12 + $0x18] sm:$0xff] (!%p1123_p6)   ;;  %v1339_v43 = vld [vmem:[#allocation12 + $0x20] sm:$0xff] (!%p1123_p6)   ;;  %v1340_v46 = vld [vmem:[#allocation12 + $0x28] sm:$0xff] (!%p1123_p6)  }
 0x185   : > { %1200 = vmatpush3.bf16.msra.mxu0 (!%p1123_p6), %v1335_v32  ;;  %v1341_v47 = vld [vmem:[#allocation12 + $0x30] sm:$0xff] (!%p1123_p6)   ;;  %v1342_v48 = vld [vmem:[#allocation12 + $0x38] sm:$0xff] (!%p1123_p6)   ;;  %v599_v49 = vld [vmem:[%s1811_s2] sm:$0x1] (!%p1123_p6) }
 0x186   : > { %1201 = vmatprep.subr.bf16.mxu0 (!%p1123_p6), %v1543_v33  ;;  %v592_v36 = vld [vmem:[#allocation3] sm:$0x1] (!%p1123_p6)  ;;  %v604_v52 = vld [vmem:[%s1812_s3] sm:$0x1] (!%p1123_p6) }
 0x187   : > { %v593_v38 = vmul.f32 (!%p1123_p6), 0.125, %v592_v36  ;;  %608 = vst [vmem:[#allocation3] sm:$0x1] (!%p1123_p6), %v1543_v33  ;;  %v611_v55 = vld [vmem:[#allocation2] sm:$0xff] (!%p1123_p6) }
 0x188   : > { %v594_v37 = vld [vmem:[#allocation4] sm:$0x1] (!%p1123_p6) }
 0x189   : > { %1202 = vmatpush3.bf16.msra.mxu0 (!%p1123_p6), %v1336_v34  ;;  %v595_v39 = vmul.f32 (!%p1123_p6), 0.125, %v594_v37  ;;  %609 = vst [vmem:[#allocation4] sm:$0x1] (!%p1123_p6), %v1543_v33  ;;  %v596_v41 = vmul.f32 (!%p1123_p6), %v593_v38, %v593_v38 }
 0x18a   : > { %1203 = vmatprep.subr.bf16.mxu0 (!%p1123_p6), %v1543_v33 }
 0x18b   : > { %v597_v42 = vsub.f32 %v595_v39, %v596_v41 }
 0x18d   : > { %1204 = vmatpush3.bf16.msra.mxu0 %v1337_v35  ;;  %v598_v44 = vmax.f32 %v597_v42, 0.0 }
 0x18e   : > { %1205 = vmatprep.subr.bf16.mxu0 %v1543_v33  ;;  %v735_v12 = vld [vmem:[#allocation3] sm:$0x1] }
 0x18f   : > { %v600_v45 = vadd.f32 1e-05, %v598_v44 }
 0x190   : > { %v744_v15 = vld [vmem:[#allocation4] sm:$0x1] }
 0x191   : > { %1206 = vmatpush3.bf16.msra.mxu0 %v1338_v40  ;;  %1343 = vrsqrt.f32 %v600_v45 }
 0x192   : > { %1207 = vmatprep.subr.bf16.mxu0 %v1543_v33 }
 0x195   : > { %1208 = vmatpush3.bf16.msra.mxu0 %v1339_v43 }
 0x196   : > { %1209 = vmatprep.subr.bf16.mxu0 %v1543_v33 }
 0x199   : > { %1210 = vmatpush3.bf16.msra.mxu0 %v1340_v46 }
 0x19a   : > { %1211 = vmatprep.subr.bf16.mxu0 %v1543_v33 }
 0x19b   : > { %v1344_v50 = vpop.eup %1343 }
 0x19c   : > { %v602_v51 = vmul.f32 %v1344_v50, %v599_v49 }
 0x19d   : > { %1212 = vmatpush3.bf16.msra.mxu0 %v1341_v47 }
 0x19e   : > { %1213 = vmatprep.subr.bf16.mxu0 %v1543_v33  ;;  %603 = vst [vmem:[#allocation5] sm:$0x1] %v602_v51  ;;  %v605_v53 = vmul.f32 %v602_v51, %v593_v38 }
 0x1a0   : > { %v606_v54 = vsub.f32 %v604_v52, %v605_v53 }
 0x1a1   : > { %1214 = vmatpush3.bf16.msra.mxu0 %v1342_v48 }
 0x1a2   : > { %607 = vst [vmem:[#allocation6] sm:$0x1] %v606_v54 }
 0x1a5   : > { %v1124_v56 = vld [vmem:[#allocation5] ss:$0 sm:$0xff] }
 0x1a6   : > { %v619_v57 = vmul.f32 %v1124_v56, %v611_v55 }
 0x1a9   : > { %v1125_v58 = vld [vmem:[#allocation6] ss:$0 sm:$0xff] }
 0x1aa   : > { %v627_v59 = vadd.f32 %v1125_v58, %v619_v57 }
 0x1ac   : > { %v628_v60 = vmax.f32 %v627_v59, 0.0 }
 0x1ae   : > { %v629_v61 = vpack.c.bf16 %v628_v60, %v628_v60 }
 0x1b0   : > { %1216 = vmatmul.mubr.bf16.vlgmr.msra.gmra.mrb[0].mxu0 %v629_v61 }
 0x283   : > { %v728_v62 = vpop.f32.mrb[0].mxu0 }
 0x284   : > { %734 = vst [vmem:[#allocation2] sm:$0xff] %v728_v62  ;;  %v736_v63 = vrot.slane %v728_v62, 4  ;;  %v745_v0 = vmul.f32 %v728_v62, %v728_v62  ;;  %v1217_v1 = vpop.f32.mrb[1].mxu0 }
 0x285   : > { %v731_v2 = vpop.f32.mrb[2].mxu0 }
 0x286   : > { %v737_v3 = vadd.f32 %v736_v63, %v728_v62  ;;  %v746_v4 = vrot.slane %v745_v0, 4  ;;  %v1218_v5 = vpop.f32.mrb[3].mxu0 }
 0x288   : > { %v738_v6 = vrot.slane %v737_v3, 2  ;;  %v747_v7 = vadd.f32 %v746_v4, %v745_v0 }
 0x28a   : > { %v739_v8 = vadd.f32 %v738_v6, %v737_v3  ;;  %v748_v9 = vrot.slane %v747_v7, 2 }
 0x28c   : > { %v740_v10 = vrot.slane %v739_v8, 1  ;;  %v749_v11 = vadd.f32 %v748_v9, %v747_v7 }
 0x28e   : > { %v741_v13 = vadd.f32 %v740_v10, %v739_v8  ;;  %v750_v14 = vrot.slane %v749_v11, 1 }
 0x290   : > { %v742_v16 = vadd.f32 %v741_v13, %v735_v12  ;;  %v751_v17 = vadd.f32 %v750_v14, %v749_v11 }
 0x292   : > { %743 = vst [vmem:[#allocation3] sm:$0x1] %v742_v16  ;;  %v752_v18 = vadd.f32 %v751_v17, %v744_v15 }
 0x294   : > { %753 = vst [vmem:[#allocation4] sm:$0x1] %v752_v18 }
 0x295 PF: > { %p1134_p10 = scmp.ne.s32.totalorder %s1525_s13, 2 }
 0x296   : > { %v1345_v19 = vld [vmem:[#allocation13] sm:$0xff] (!%p1134_p10)   ;;  %v1545_v20 = vmov (!%p1134_p10), 0.0   ;;  %v1346_v21 = vld [vmem:[#allocation13 + $0x8] sm:$0xff] (!%p1134_p10)   ;;  %vm1546_vm2 = vmmov (!%p1134_p10), 0   ;;  %v1347_v22 = vld [vmem:[#allocation13 + $0x10] sm:$0xff] (!%p1134_p10)  }
 0x297   : > { %757 = sbr.rel (%p1134_p10) target bundleno = 936 (0x3a8), region = 96  ;;  %1219 = vmatprep.subr.bf16.mxu0 (!%p1134_p10), %v1545_v20  ;;  %1235 = vmatprep.mubr.msk.bf16.mxu0 (!%p1134_p10), %vm1546_vm2, %v1545_v20  ;;  %v1348_v27 = vld [vmem:[#allocation13 + $0x18] sm:$0xff] (!%p1134_p10)   ;;  %v1349_v30 = vld [vmem:[#allocation13 + $0x20] sm:$0xff] (!%p1134_p10)   ;;  %v1350_v33 = vld [vmem:[#allocation13 + $0x28] sm:$0xff] (!%p1134_p10)  }
 0x298   : > { %1220 = vmatpush3.bf16.msra.mxu0 (!%p1134_p10), %v1345_v19  ;;  %v1351_v34 = vld [vmem:[#allocation13 + $0x30] sm:$0xff] (!%p1134_p10)   ;;  %v1352_v35 = vld [vmem:[#allocation13 + $0x38] sm:$0xff] (!%p1134_p10)   ;;  %v769_v36 = vld [vmem:[%s1814_s5] sm:$0x1] (!%p1134_p10) }
 0x299   : > { %1221 = vmatprep.subr.bf16.mxu0 (!%p1134_p10), %v1545_v20  ;;  %v762_v23 = vld [vmem:[#allocation3] sm:$0x1] (!%p1134_p10)  ;;  %v774_v39 = vld [vmem:[%s1815_s6] sm:$0x1] (!%p1134_p10) }
 0x29a   : > { %v763_v25 = vmul.f32 (!%p1134_p10), 0.125, %v762_v23  ;;  %778 = vst [vmem:[#allocation3] sm:$0x1] (!%p1134_p10), %v1545_v20  ;;  %v781_v42 = vld [vmem:[#allocation2] sm:$0xff] (!%p1134_p10) }
 0x29b   : > { %v764_v24 = vld [vmem:[#allocation4] sm:$0x1] (!%p1134_p10) }
 0x29c   : > { %1222 = vmatpush3.bf16.msra.mxu0 (!%p1134_p10), %v1346_v21  ;;  %v765_v26 = vmul.f32 (!%p1134_p10), 0.125, %v764_v24  ;;  %779 = vst [vmem:[#allocation4] sm:$0x1] (!%p1134_p10), %v1545_v20  ;;  %v766_v28 = vmul.f32 (!%p1134_p10), %v763_v25, %v763_v25 }
 0x29d   : > { %1223 = vmatprep.subr.bf16.mxu0 (!%p1134_p10), %v1545_v20 }
 0x29e   : > { %v767_v29 = vsub.f32 %v765_v26, %v766_v28 }
 0x2a0   : > { %1224 = vmatpush3.bf16.msra.mxu0 %v1347_v22  ;;  %v768_v31 = vmax.f32 %v767_v29, 0.0 }
 0x2a1   : > { %1225 = vmatprep.subr.bf16.mxu0 %v1545_v20  ;;  %v905_v63 = vld [vmem:[#allocation3] sm:$0x1] }
 0x2a2   : > { %v770_v32 = vadd.f32 1e-05, %v768_v31 }
 0x2a3   : > { %v914_v2 = vld [vmem:[#allocation4] sm:$0x1] }
 0x2a4   : > { %1226 = vmatpush3.bf16.msra.mxu0 %v1348_v27  ;;  %1353 = vrsqrt.f32 %v770_v32 }
 0x2a5   : > { %1227 = vmatprep.subr.bf16.mxu0 %v1545_v20 }
 0x2a8   : > { %1228 = vmatpush3.bf16.msra.mxu0 %v1349_v30 }
 0x2a9   : > { %1229 = vmatprep.subr.bf16.mxu0 %v1545_v20 }
 0x2ac   : > { %1230 = vmatpush3.bf16.msra.mxu0 %v1350_v33 }
 0x2ad   : > { %1231 = vmatprep.subr.bf16.mxu0 %v1545_v20 }
 0x2ae   : > { %v1354_v37 = vpop.eup %1353 }
 0x2af   : > { %v772_v38 = vmul.f32 %v1354_v37, %v769_v36 }
 0x2b0   : > { %1232 = vmatpush3.bf16.msra.mxu0 %v1351_v34 }
 0x2b1   : > { %1233 = vmatprep.subr.bf16.mxu0 %v1545_v20  ;;  %773 = vst [vmem:[#allocation5] sm:$0x1] %v772_v38  ;;  %v775_v40 = vmul.f32 %v772_v38, %v763_v25 }
 0x2b3   : > { %v776_v41 = vsub.f32 %v774_v39, %v775_v40 }
 0x2b4   : > { %1234 = vmatpush3.bf16.msra.mxu0 %v1352_v35 }
 0x2b5   : > { %777 = vst [vmem:[#allocation6] sm:$0x1] %v776_v41 }
 0x2b8   : > { %v1135_v43 = vld [vmem:[#allocation5] ss:$0 sm:$0xff] }
 0x2b9   : > { %v789_v44 = vmul.f32 %v1135_v43, %v781_v42 }
 0x2bc   : > { %v1136_v45 = vld [vmem:[#allocation6] ss:$0 sm:$0xff] }
 0x2bd   : > { %v797_v46 = vadd.f32 %v1136_v45, %v789_v44 }
 0x2bf   : > { %v798_v47 = vmax.f32 %v797_v46, 0.0 }
 0x2c1   : > { %v799_v48 = vpack.c.bf16 %v798_v47, %v798_v47 }
 0x2c3   : > { %1236 = vmatmul.mubr.bf16.vlgmr.msra.gmra.mrb[0].mxu0 %v799_v48 }
 0x396   : > { %v898_v49 = vpop.f32.mrb[0].mxu0 }
 0x397   : > { %904 = vst [vmem:[#allocation2] sm:$0xff] %v898_v49  ;;  %v906_v50 = vrot.slane %v898_v49, 4  ;;  %v915_v51 = vmul.f32 %v898_v49, %v898_v49  ;;  %v1237_v52 = vpop.f32.mrb[1].mxu0 }
 0x398   : > { %v901_v53 = vpop.f32.mrb[2].mxu0 }
 0x399   : > { %v907_v54 = vadd.f32 %v906_v50, %v898_v49  ;;  %v916_v55 = vrot.slane %v915_v51, 4  ;;  %v1238_v56 = vpop.f32.mrb[3].mxu0 }
 0x39b   : > { %v908_v57 = vrot.slane %v907_v54, 2  ;;  %v917_v58 = vadd.f32 %v916_v55, %v915_v51 }
 0x39d   : > { %v909_v59 = vadd.f32 %v908_v57, %v907_v54  ;;  %v918_v60 = vrot.slane %v917_v58, 2 }
 0x39f   : > { %v910_v61 = vrot.slane %v909_v59, 1  ;;  %v919_v62 = vadd.f32 %v918_v60, %v917_v58 }
 0x3a1   : > { %v911_v0 = vadd.f32 %v910_v61, %v909_v59  ;;  %v920_v1 = vrot.slane %v919_v62, 1 }
 0x3a3   : > { %v912_v3 = vadd.f32 %v911_v0, %v905_v63  ;;  %v921_v4 = vadd.f32 %v920_v1, %v919_v62 }
 0x3a5   : > { %913 = vst [vmem:[#allocation3] sm:$0x1] %v912_v3  ;;  %v922_v5 = vadd.f32 %v921_v4, %v914_v2 }
 0x3a7   : > { %923 = vst [vmem:[#allocation4] sm:$0x1] %v922_v5 }
 0x3a8 PF: > { %p1145_p11 = scmp.ne.s32.totalorder %s1525_s13, 3 }
 0x3a9   : > { %v1547_v10 = vmov (!%p1145_p11), 0.0   ;;  %v939_v15 = vld [vmem:[%s1817_s8] sm:$0x1] (!%p1145_p11) }
 0x3aa   : > { %927 = sbr.rel (%p1145_p11) target bundleno = 981 (0x3d5), region = 104  ;;  %v944_v18 = vld [vmem:[%s1818_s9] sm:$0x1] (!%p1145_p11) }
 0x3ab   : > { %v951_v21 = vld [vmem:[#allocation2] sm:$0xff] (!%p1145_p11) }
 0x3ac   : > { %v932_v6 = vld [vmem:[#allocation3] sm:$0x1] (!%p1145_p11) }
 0x3ad   : > { %v933_v8 = vmul.f32 (!%p1145_p11), 0.125, %v932_v6  ;;  %948 = vst [vmem:[#allocation3] sm:$0x1] (!%p1145_p11), %v1547_v10 }
 0x3ae   : > { %v934_v7 = vld [vmem:[#allocation4] sm:$0x1] (!%p1145_p11) }
 0x3af   : > { %v935_v9 = vmul.f32 (!%p1145_p11), 0.125, %v934_v7  ;;  %949 = vst [vmem:[#allocation4] sm:$0x1] (!%p1145_p11), %v1547_v10  ;;  %v936_v11 = vmul.f32 (!%p1145_p11), %v933_v8, %v933_v8 }
 0x3b1   : > { %v937_v12 = vsub.f32 %v935_v9, %v936_v11 }
 0x3b3   : > { %v938_v13 = vmax.f32 %v937_v12, 0.0 }
 0x3b5   : > { %v940_v14 = vadd.f32 1e-05, %v938_v13 }
 0x3b7   : > { %1355 = vrsqrt.f32 %v940_v14 }
 0x3c1   : > { %v1356_v16 = vpop.eup %1355 }
 0x3c2   : > { %v942_v17 = vmul.f32 %v1356_v16, %v939_v15 }
 0x3c4   : > { %943 = vst [vmem:[#allocation5] sm:$0x1] %v942_v17  ;;  %v945_v19 = vmul.f32 %v942_v17, %v933_v8 }
 0x3c6   : > { %v946_v20 = vsub.f32 %v944_v18, %v945_v19 }
 0x3c8   : > { %947 = vst [vmem:[#allocation6] sm:$0x1] %v946_v20 }
 0x3cb   : > { %v1146_v22 = vld [vmem:[#allocation5] ss:$0 sm:$0xff] }
 0x3cc   : > { %v959_v23 = vmul.f32 %v1146_v22, %v951_v21 }
 0x3cf   : > { %v1147_v24 = vld [vmem:[#allocation6] ss:$0 sm:$0xff] }
 0x3d0   : > { %v967_v25 = vadd.f32 %v1147_v24, %v959_v23 }
 0x3d2   : > { %v968_v26 = vmax.f32 %v967_v25, 0.0 }
 0x3d4   : > { %969 = vst [vmem:[#allocation15] sm:$0xff] %v968_v26 }
 0x3d5 PF: > { %s1837_s18 = sadd.s32 4294967295, %s1533_s15   ;;  %s1548_s26 = smov [#allocation15]  }
 0x3d6   : > { %p1775_p12 = scmp.eq.s32.totalorder %s1837_s18, 3  ;;  %s986_s27 = sshll.u32 %s1548_s26, 4  ;;  %s987_s27 = int_to_ptr.vmem [resolvable:$true] %s986_s27 }
 0x3d7   : > { %s1469_s12 = scalar_lea.vmem %s987_s27, 128  ;;  %s1475_s29 = scalar_lea.vmem %s987_s27, 256 }
 0x3d8   : > { %p1470_p13 = scmp.ne.s32.totalorder %s987_s27, %s1469_s12  ;;  %p1476_p2 = scmp.lt.s32.totalorder %s987_s27, %s987_s27 }
 0x3d9   : > { %p1477_p5 = scmp.lt.s32.totalorder %s1475_s29, %s1469_s12 }
 0x3da   : > { %p1471_p0 = pnand %p1470_p13, %p1775_p12 }
 0x3db   : > { %p1478_p4 = por %p1477_p5, %p1476_p2 }
 0x3dc   : > { %p1472_p1 = pneg %p1471_p0 }
 0x3de   : > { %p1479_p8 = pnand %p1478_p4, %p1472_p1 }
 0x3e0   : > { %1482 = shalt.err (!%p1479_p8)
}
 0x3e1   : > { %s1839_s19 = sld [smem:[#allocation22_spill]] }
 0x3e7   : > { %s1483_s20 = scalar_lea.hbm %s1839_s19, 128 }
 0x3e8   : > { %p1484_p3 = scmp.ne.s32.totalorder %s1839_s19, %s1483_s20  ;;  %p1489_p6 = scmp.lt.u32.totalorder %s1483_s20, %s1839_s19 }
 0x3ea   : > { %p1485_p9 = pnand %p1484_p3, %p1775_p12 }
 0x3ec   : > { %p1486_p7 = pneg %p1485_p9 }
 0x3ee   : > { %p1491_p10 = pnand %p1489_p6, %p1486_p7 }
 0x3f0   : > { %1494 = shalt.err (!%p1491_p10)
}
 0x3f1   : > { %1256 = dma.vmem_to_hbm [thread:$0]  (%p1775_p12), %s987_s27, 128, %s1839_s19, [#allocation9]  }
 0x3f2 PF: > { %p1287_p11 = scmp.ge.s32.totalorder %s1533_s15, 2  ;;  %s1840_s16 = sadd.s32 4294967294, %s1533_s15  }
 0x3f3   : > { %p1288_p13 = scmp.eq.s32.totalorder %s1840_s16, 3 }
 0x3f5   : > { %p1274_p0 = pnand %p1288_p13, %p1287_p11 }
 0x3f7   : > { %1520 = dma.done.wait (!%p1274_p0), [#allocation9], 128  }
 0x3f8   : > { %1522 = vsyncadd (!%p1274_p0), [#allocation9], 4294967168  ;;  %s28_s15 = sadd.s32 1, %s1533_s15   ;;  %s1841_s13 = sld [smem:[#allocation20_spill]] }
 0x3f9   : > { %p25_p1 = scmp.ge.s32.totalorder %s28_s15, 6   ;;  %s1842_s14 = sld [smem:[#allocation21_spill]] }
 0x3fb   :  { %27 = sbr.rel (!%p25_p1) target bundleno = 9 (0x9), region = 153 }
 0x402   :  { %1004 = vsyncpa [#allocation8], 1 }
 0x403   :  { %1006 = vsyncpa [#allocation8 + $0x1], 1 }
 0x404   :  { %1007 = vsyncpa [#allocation11], 1 }
 0x405   :  { %1008 = vsyncpa [#allocation14], 1 }
 0x406   :  { %1009 = vsyncpa [#allocation9], 1 }
 0x407   :  { %1011 = vsyncpa [#allocation9 + $0x1], 1 }

</bundles_post_ra>
